<compile_context>
chip_gen: v7x
topology: tpu7x:2x2x1
jax: 0.10.0
libtpu: 0.0.40
codegen_flags: <defaults>
</compile_context>

<pallas_src>
import jax
import jax.numpy as jnp
from jax import lax
from jax.experimental import pallas as pl
from jax.experimental.pallas import tpu as pltpu  # noqa: F401  (kept for TPU-specific extensions)


def _round_up(x, m):
    return (x + m - 1) // m * m


def _orth_reg_kernel(xz_ref, xtr_sh_ref, s_pad_ref, scale_ref, gram_ref):
    """Fused Gram kernel.

    xz_ref:     (R_pad, LP) f32  pre-packed [X_train | X_val | 0 | 0] column blocks
    xtr_sh_ref: (N_train, LP) f32  X_train pre-shifted to lanes [2D:3D)
    s_pad_ref:  (R_pad, N_train) f32  S zero-padded along rows
    scale_ref:  (1, LP) f32  per-column 1/N scale (zero outside the 3 blocks)
    gram_ref:   (3D, LP) f32  output slab; the three DxD diagonal blocks are the Sigmas.
    NOTE: only the three diagonal DxD blocks of the slab are meaningful; the
    off-diagonal blocks carry mixed scaling and are discarded by the wrapper.
    """
    # sel block, already placed at rows [0:K) and lanes [2D:3D) by construction:
    #   S_pad @ X_train_shifted  (MXU, f32 accumulation)
    sel_p = jnp.dot(s_pad_ref[...], xtr_sh_ref[...],
                    preferred_element_type=jnp.float32)          # (R_pad, LP)

    # Z lives purely in vregs: pre-packed X blocks + sel block (disjoint lanes/rows).
    z = xz_ref[...] + sel_p                                       # (R_pad, LP)

    # Fold the per-block 1/N scaling into the RHS operand (8-vreg VPU multiply).
    z_rhs = z * scale_ref[...]

    # One lane-dense Gram on the MXU: G = Z^T (Z * scale), contract over samples.
    g = lax.dot_general(z, z_rhs, (((0,), (0,)), ((), ())),
                        preferred_element_type=jnp.float32)       # (LP, LP)

    # Only the first 3D rows are ever consumed.
    gram_ref[...] = g[0:gram_ref.shape[0], :]


def orthogonal_regularizer_forward(x_train, x_val, s):
    """OrthogonalRegularizer compute as a single fused Pallas kernel.

    Returns (Sigma_train, Sigma_train_selection, Sigma_val), each (D, D) f32.
    """
    n_train, d = x_train.shape
    n_val, d_v = x_val.shape
    k, n_s = s.shape
    assert d == d_v and n_s == n_train

    r_pad = _round_up(max(n_train, n_val, k), 8)   # padded sample (contraction) axis
    lp = _round_up(3 * d, 128)                     # padded lane axis (>= 128)
    out_rows = _round_up(3 * d, 8)                 # 3D rows (96 for D=32)

    f32 = jnp.float32
    x_train = x_train.astype(f32)
    x_val = x_val.astype(f32)
    s = s.astype(f32)

    # ---- wrapper-side layout plumbing (lane-dense packing, zero padding) ----
    xz = jnp.zeros((r_pad, lp), f32)
    xz = xz.at[:n_train, 0:d].set(x_train)
    xz = xz.at[:n_val, d:2 * d].set(x_val)

    xtr_sh = jnp.zeros((n_train, lp), f32).at[:, 2 * d:3 * d].set(x_train)
    s_pad = jnp.zeros((r_pad, n_train), f32).at[:k, :].set(s)

    scale = jnp.concatenate([
        jnp.full((1, d), 1.0 / n_train, f32),
        jnp.full((1, d), 1.0 / n_val, f32),
        jnp.full((1, d), 1.0 / k, f32),
        jnp.zeros((1, lp - 3 * d), f32),
    ], axis=1)

    full = lambda shp: pl.BlockSpec(shp, lambda: tuple(0 for _ in shp))

    flops = 2 * r_pad * n_train * lp + 2 * r_pad * lp * lp
    bytes_accessed = 4 * (r_pad * lp + n_train * lp + r_pad * n_train + lp
                          + out_rows * lp)

    gram = pl.pallas_call(
        _orth_reg_kernel,
        out_shape=jax.ShapeDtypeStruct((out_rows, lp), f32),
        in_specs=[
            full((r_pad, lp)),
            full((n_train, lp)),
            full((r_pad, n_train)),
            full((1, lp)),
        ],
        out_specs=full((out_rows, lp)),
        cost_estimate=pl.CostEstimate(
            flops=flops, transcendentals=0, bytes_accessed=bytes_accessed),
    )(xz, xtr_sh, s_pad, scale)

    # Slice the three diagonal DxD blocks out of the lane-dense slab (wrapper side).
    sigma_train = gram[0:d, 0:d]
    sigma_val = gram[d:2 * d, d:2 * d]
    sigma_sel = gram[2 * d:3 * d, 2 * d:3 * d]
    return sigma_train, sigma_sel, sigma_val


if __name__ == "__main__":
    # Deterministic synthetic inputs (small shapes implied by the forward):
    #   X_train: (N_train, D), X_val: (N_val, D), S: (K, N_train)
    N_TRAIN, N_VAL, D, K = 64, 32, 32, 16

    key = jax.random.PRNGKey(0)
    k1, k2, k3 = jax.random.split(key, 3)
    x_train = jax.random.normal(k1, (N_TRAIN, D), dtype=jnp.float32)
    x_val = jax.random.normal(k2, (N_VAL, D), dtype=jnp.float32)
    s = jax.random.normal(k3, (K, N_TRAIN), dtype=jnp.float32)

    sig_tr, sig_sel, sig_val = orthogonal_regularizer_forward(x_train, x_val, s)
    jax.block_until_ready((sig_tr, sig_sel, sig_val))

    # Lightweight correctness check against plain JAX reference.
    ref_tr = x_train.T @ x_train / N_TRAIN
    sel = s @ x_train
    ref_sel = sel.T @ sel / K
    ref_val = x_val.T @ x_val / N_VAL
    assert jnp.allclose(sig_tr, ref_tr, atol=1e-4, rtol=1e-4)
    assert jnp.allclose(sig_sel, ref_sel, atol=1e-4, rtol=1e-4)
    assert jnp.allclose(sig_val, ref_val, atol=1e-4, rtol=1e-4)

    print("KERNEL_OK")
</pallas_src>

<mosaic_0001>
module attributes {stable_mosaic.version = 11 : i64} {
  func.func @_orth_reg_kernel(%arg0: memref<64x128xf32, #tpu.memory_space<vmem>>, %arg1: memref<64x128xf32, #tpu.memory_space<vmem>>, %arg2: memref<64x64xf32, #tpu.memory_space<vmem>>, %arg3: memref<1x128xf32, #tpu.memory_space<vmem>>, %arg4: memref<96x128xf32, #tpu.memory_space<vmem>>) attributes {dimension_semantics = [], scalar_prefetch = 0 : i64, scratch_operands = 0 : i64, tpu.core_type = #tpu.core_type<tc>} {
    %c0 = arith.constant 0 : index
    %c0_0 = arith.constant 0 : index
    %0 = vector.load %arg2[%c0, %c0_0] : memref<64x64xf32, #tpu.memory_space<vmem>>, vector<64x64xf32>
    %c0_1 = arith.constant 0 : index
    %c0_2 = arith.constant 0 : index
    %1 = vector.load %arg1[%c0_1, %c0_2] : memref<64x128xf32, #tpu.memory_space<vmem>>, vector<64x128xf32>
    %cst = arith.constant dense<0.000000e+00> : vector<64x128xf32>
    %2 = tpu.matmul %0, %1, %cst {dimension_numbers = #tpu.dot_dimension_numbers<[1], [0], [0], [1], [0, 0, 1, 1], [], []>} : vector<64x64xf32>, vector<64x128xf32>, vector<64x128xf32> -> vector<64x128xf32>
    %c0_3 = arith.constant 0 : index
    %c0_4 = arith.constant 0 : index
    %3 = vector.load %arg0[%c0_3, %c0_4] : memref<64x128xf32, #tpu.memory_space<vmem>>, vector<64x128xf32>
    %4 = arith.addf %3, %2 : vector<64x128xf32>
    %c0_5 = arith.constant 0 : index
    %c0_6 = arith.constant 0 : index
    %5 = vector.load %arg3[%c0_5, %c0_6] : memref<1x128xf32, #tpu.memory_space<vmem>>, vector<1x128xf32>
    %6 = vector.broadcast %5 : vector<1x128xf32> to vector<64x128xf32>
    %7 = arith.mulf %4, %6 : vector<64x128xf32>
    %cst_7 = arith.constant dense<0.000000e+00> : vector<128x128xf32>
    %8 = tpu.matmul %4, %7, %cst_7 {dimension_numbers = #tpu.dot_dimension_numbers<[0], [0], [1], [1], [0, 1, 1, 1], [], []>} : vector<64x128xf32>, vector<64x128xf32>, vector<128x128xf32> -> vector<128x128xf32>
    %9 = vector.extract_strided_slice %8 {offsets = [0, 0], sizes = [96, 128], strides = [1, 1]} : vector<128x128xf32> to vector<96x128xf32>
    %c0_8 = arith.constant 0 : index
    %c0_9 = arith.constant 0 : index
    %10 = vector.load %arg4[%c0_8, %c0_9] : memref<96x128xf32, #tpu.memory_space<vmem>>, vector<96x128xf32>
    tpu.vector_store %arg4[%c0_8, %c0_9], %9 {strides = array<i32>} : memref<96x128xf32, #tpu.memory_space<vmem>>, vector<96x128xf32>,
    return
  }
}

</mosaic_0001>

<bundles_post_ra>
// kernel: tpu_custom_call.1
= control target key start
LH: loop header
LB: loop body
LE: loop exit
PB: predicated region body
PF: predicated region fallthrough
CT: control target
= control target key end

     0   :  { %9 = vsyncpa [#allocation3], 0  ;;  %s886_s0 = inlined_call_operand.hbm [shape: f32[64,128], index: 0, kind: input, shape index: {}]   ;;  %s887_s1 = inlined_call_operand.hbm [shape: f32[64,128], index: 1, kind: input, shape index: {}]   ;;  %s888_s2 = inlined_call_operand.hbm [shape: f32[64,64], index: 2, kind: input, shape index: {}]   ;;  %s889_s3 = inlined_call_operand.vmem [shape: f32[1,128], index: 3, kind: input, shape index: {}]   ;;  %s890_s4 = inlined_call_operand.hbm [shape: f32[96,128], index: 4, kind: output, shape index: {}]  }
   0x1   :  { %10 = vsyncpa [#allocation6], 0 }
   0x2   :  { %11 = vsyncpa [#allocation4], 0  ;;  %s761_s15 = smov [#allocation5]   ;;  %s762_s17 = smov [#allocation2]  }
   0x3   :  { %s29_s16 = sshll.u32 %s761_s15, 4  ;;  %s17_s18 = sshll.u32 %s762_s17, 4  ;;  %s30_s16 = int_to_ptr.vmem [resolvable:$true] %s29_s16  ;;  %s792_s18 = int_to_ptr.vmem [resolvable:$true] %s17_s18 }
   0x4   :  { %s667_s21 = scalar_lea.hbm %s887_s1, 1024 }
   0x5   :  { %p668_p0 = scmp.ne.s32.totalorder %s887_s1, %s667_s21  ;;  %p671_p1 = scmp.lt.u32.totalorder %s667_s21, %s887_s1 }
   0x7   :  { %p673_p2 = pnand %p671_p1, %p668_p0 }
   0x9   :  { %676 = shalt.err (!%p673_p2)
}
   0xa   :  { %s677_s26 = scalar_lea.vmem %s30_s16, 1024  ;;  %p682_p4 = scmp.lt.s32.totalorder %s30_s16, %s30_s16 }
   0xb   :  { %p678_p3 = scmp.ne.s32.totalorder %s30_s16, %s677_s26  ;;  %p683_p5 = scmp.lt.s32.totalorder %s677_s26, %s677_s26 }
   0xd   :  { %p684_p6 = por %p683_p5, %p682_p4 }
   0xf   :  { %p685_p7 = pnand %p684_p6, %p678_p3 }
  0x11   :  { %688 = shalt.err (!%p685_p7)
}
  0x12   :  { %s763_s27 = smov 128   ;;  %s764_s28 = smov 8  }
  0x13   :  { %35 = dma.hbm_to_vmem [thread:$0]  %s887_s1, 1024, %s30_s16, [#allocation6], %s763_s27, %s763_s27, %s764_s28  }
  0x14   :  { %s689_s7 = scalar_lea.hbm %s886_s0, 1024 }
  0x15   :  { %p690_p8 = scmp.ne.s32.totalorder %s886_s0, %s689_s7  ;;  %p693_p9 = scmp.lt.u32.totalorder %s689_s7, %s886_s0 }
  0x17   :  { %p695_p10 = pnand %p693_p9, %p690_p8 }
  0x19   :  { %698 = shalt.err (!%p695_p10)
}
  0x1a   :  { %s699_s12 = scalar_lea.vmem %s792_s18, 1024  ;;  %p704_p12 = scmp.lt.s32.totalorder %s792_s18, %s792_s18 }
  0x1b   :  { %p700_p11 = scmp.ne.s32.totalorder %s792_s18, %s699_s12  ;;  %p705_p13 = scmp.lt.s32.totalorder %s699_s12, %s699_s12 }
  0x1d   :  { %p706_p0 = por %p705_p13, %p704_p12 }
  0x1f   :  { %p707_p1 = pnand %p706_p0, %p700_p11 }
  0x21   :  { %710 = shalt.err (!%p707_p1)
}
  0x22   :  { %23 = dma.hbm_to_vmem [thread:$0]  %s886_s0, 1024, %s792_s18, [#allocation3], %s763_s27, %s763_s27, %s764_s28  }
  0x23   :  { %s765_s14 = smov [#allocation7]   ;;  %s711_s19 = scalar_lea.hbm %s888_s2, 1024 }
  0x24   :  { %s41_s15 = sshll.u32 %s765_s14, 4  ;;  %p712_p2 = scmp.ne.s32.totalorder %s888_s2, %s711_s19  ;;  %s42_s15 = int_to_ptr.vmem [resolvable:$true] %s41_s15 }
  0x25   :  { %p715_p3 = scmp.lt.u32.totalorder %s711_s19, %s888_s2 }
  0x27   :  { %p717_p4 = pnand %p715_p3, %p712_p2 }
  0x29   :  { %720 = shalt.err (!%p717_p4)
}
  0x2a   :  { %s721_s24 = scalar_lea.vmem %s42_s15, 1024  ;;  %p726_p6 = scmp.lt.s32.totalorder %s42_s15, %s42_s15 }
  0x2b   :  { %p722_p5 = scmp.ne.s32.totalorder %s42_s15, %s721_s24  ;;  %p727_p7 = scmp.lt.s32.totalorder %s721_s24, %s721_s24 }
  0x2d   :  { %p728_p8 = por %p727_p7, %p726_p6 }
  0x2f   :  { %p729_p9 = pnand %p728_p8, %p722_p5 }
  0x31   :  { %732 = shalt.err (!%p729_p9)
}
  0x32   :  { %47 = dma.hbm_to_vmem [thread:$0]  %s888_s2, 1024, %s42_s15, [#allocation6], %s763_s27, %s763_s27, %s764_s28  }
  0x33   :  { %755 = dma.done.wait [#allocation3], 1024  }
  0x34   :  { %756 = vsyncadd [#allocation3], 4294966272 }
  0x35   :  { %757 = dma.done.wait [#allocation6], 2048  }
  0x36   :  { %758 = vsyncadd [#allocation6], 4294965248  ;;  %v67_v0 = vld [vmem:[#allocation5] sm:$0xff]  ;;  %v68_v1 = vld [vmem:[#allocation5 + $0x8] sm:$0xff]  ;;  %vm75_vm0 = vcmask 523264  }
  0x37   :  { %v69_v2 = vld [vmem:[#allocation5 + $0x10] sm:$0xff]  ;;  %v620_v3 = vpack.c.bf16 %v68_v1, %v67_v0  ;;  %v70_v4 = vld [vmem:[#allocation5 + $0x18] sm:$0xff]  ;;  %v71_v6 = vld [vmem:[#allocation5 + $0x20] sm:$0xff] }
  0x38   :  { %v624_v5 = vpack.c.bf16 %v70_v4, %v69_v2  ;;  %v72_v7 = vld [vmem:[#allocation5 + $0x28] sm:$0xff]  ;;  %v59_v8 = vld [vmem:[#allocation7] sm:$0xff]  ;;  %v73_v10 = vld [vmem:[#allocation5 + $0x30] sm:$0xff] }
  0x39   :  { %621 = vmatprep.subr.bf16.mxu0 %v620_v3  ;;  %568 = vmatprep.mubr.msk.f32.mxu0 %vm75_vm0, %v59_v8  ;;  %v628_v9 = vpack.c.bf16 %v72_v7, %v71_v6  ;;  %v74_v11 = vld [vmem:[#allocation5 + $0x38] sm:$0xff]  ;;  %v60_v13 = vld [vmem:[#allocation7 + $0x8] sm:$0xff]  ;;  %v61_v14 = vld [vmem:[#allocation7 + $0x10] sm:$0xff] }
  0x3a   :  { %623 = vmatpush3.bf16.msra.mxu0 %v620_v3  ;;  %v632_v12 = vpack.c.bf16 %v74_v11, %v73_v10  ;;  %v62_v15 = vld [vmem:[#allocation7 + $0x18] sm:$0xff]  ;;  %v63_v16 = vld [vmem:[#allocation7 + $0x20] sm:$0xff]  ;;  %v64_v17 = vld [vmem:[#allocation7 + $0x28] sm:$0xff] }
  0x3b   :  { %625 = vmatprep.subr.bf16.mxu0 %v624_v5  ;;  %v65_v18 = vld [vmem:[#allocation7 + $0x30] sm:$0xff]  ;;  %v66_v19 = vld [vmem:[#allocation7 + $0x38] sm:$0xff]  ;;  %v206_v20 = vld [vmem:[#allocation2 + $0x8] sm:$0xff] }
  0x3c   :  { %v205_v21 = vld [vmem:[#allocation2] sm:$0xff]  ;;  %v208_v27 = vld [vmem:[#allocation2 + $0x18] sm:$0xff]  ;;  %v207_v29 = vld [vmem:[#allocation2 + $0x10] sm:$0xff] }
  0x3d   :  { %v495_v23 = vld [vmem:[%s889_s3] ss:$0 sm:$0xff]  ;;  %v210_v36 = vld [vmem:[#allocation2 + $0x28] sm:$0xff]  ;;  %v212_v45 = vld [vmem:[#allocation2 + $0x38] sm:$0xff]  ;;  %s766_s3 = smov [#allocation8]  }
  0x3e   :  { %627 = vmatpush3.bf16.msra.mxu0 %v624_v5  ;;  %v209_v38 = vld [vmem:[#allocation2 + $0x20] sm:$0xff]  ;;  %v211_v47 = vld [vmem:[#allocation2 + $0x30] sm:$0xff]  ;;  %s474_s26 = sshll.u32 %s766_s3, 4  ;;  %s475_s26 = int_to_ptr.vmem [resolvable:$true] %s474_s26 }
  0x3f   :  { %629 = vmatprep.subr.bf16.mxu0 %v628_v9  ;;  %s733_s29 = scalar_lea.vmem %s475_s26, 1536  ;;  %p738_p11 = scmp.lt.s32.totalorder %s475_s26, %s475_s26 }
  0x40   :  { %p734_p10 = scmp.ne.s32.totalorder %s475_s26, %s733_s29  ;;  %p739_p12 = scmp.lt.s32.totalorder %s733_s29, %s733_s29 }
  0x42   :  { %631 = vmatpush3.bf16.msra.mxu0 %v628_v9  ;;  %p740_p13 = por %p739_p12, %p738_p11 }
  0x43   :  { %633 = vmatprep.subr.bf16.mxu0 %v632_v12 }
  0x44   :  { %p741_p0 = pnand %p740_p13, %p734_p10 }
  0x46   :  { %635 = vmatpush3.bf16.msra.mxu0 %v632_v12 }
  0x49   :  { %569 = vmatmul.mubr.msk.f32.vlgmr.msra.gmra.mrb[0].mxu0 %vm75_vm0, %v60_v13 }
  0x4a   :  { %571 = vmatprep.mubr.msk.f32.mxu0 %vm75_vm0, %v61_v14 }
  0x4d   :  { %572 = vmatmul.mubr.msk.f32.gmra.mrb[2].mxu0 %vm75_vm0, %v62_v15 }
  0x4e   :  { %574 = vmatprep.mubr.msk.f32.mxu0 %vm75_vm0, %v63_v16 }
  0x51   :  { %575 = vmatmul.mubr.msk.f32.gmra.mrb[4].mxu0 %vm75_vm0, %v64_v17 }
  0x52   :  { %577 = vmatprep.mubr.msk.f32.mxu0 %vm75_vm0, %v65_v18 }
  0x55   :  { %578 = vmatmul.mubr.msk.f32.gmra.mrb[6].mxu0 %vm75_vm0, %v66_v19 }
 0x11c   :  { %v570_v22 = vpop.f32.mrb[0].mxu0 }
 0x11d   :  { %v214_v24 = vadd.f32 %v570_v22, %v206_v20  ;;  %v166_v25 = vpop.f32.mrb[1].mxu0 }
 0x11e   :  { %v213_v26 = vadd.f32 %v205_v21, %v166_v25 }
 0x11f   :  { %v229_v28 = vmul.f32 %v495_v23, %v214_v24 }
 0x120   :  { %v228_v30 = vmul.f32 %v495_v23, %v213_v26  ;;  %236 = vxpose.xlu0.b32.start [1/8] (short) %v213_v26, 128  ;;  %v573_v31 = vpop.f32.mrb[2].mxu0 }
 0x121   :  { %v216_v32 = vadd.f32 %v573_v31, %v208_v27  ;;  %v176_v33 = vpop.f32.mrb[3].mxu0 }
 0x122   :  { %v636_v34 = vpack.c.bf16 %v229_v28, %v228_v30  ;;  %v215_v35 = vadd.f32 %v207_v29, %v176_v33 }
 0x123   :  { %v231_v37 = vmul.f32 %v495_v23, %v216_v32 }
 0x124   :  { %v230_v39 = vmul.f32 %v495_v23, %v215_v35  ;;  %237 = vxpose.xlu0.b32.cont [2/8] (short) %v214_v24, 128  ;;  %637 = vmatprep.subr.bf16.mxu0 %v636_v34  ;;  %v576_v40 = vpop.f32.mrb[4].mxu0 }
 0x125   :  { %652 = vmatprep.subr.bf16.mxu1 %v636_v34  ;;  %639 = vmatpush3.bf16.msra.mxu0 %v636_v34  ;;  %v218_v41 = vadd.f32 %v576_v40, %v210_v36  ;;  %v186_v42 = vpop.f32.mrb[5].mxu0 }
 0x126   :  { %v640_v43 = vpack.c.bf16 %v231_v37, %v230_v39  ;;  %656 = vmatpush3.bf16.msra.mxu1 %v636_v34  ;;  %v217_v44 = vadd.f32 %v209_v38, %v186_v42 }
 0x127   :  { %v233_v46 = vmul.f32 %v495_v23, %v218_v41 }
 0x128   :  { %238 = vxpose.xlu0.b32.cont [3/8] (short) %v215_v35, 128  ;;  %641 = vmatprep.subr.bf16.mxu0 %v640_v43  ;;  %v232_v48 = vmul.f32 %v495_v23, %v217_v44  ;;  %v579_v49 = vpop.f32.mrb[6].mxu0 }
 0x129   :  { %653 = vmatprep.subr.bf16.mxu1 %v640_v43  ;;  %643 = vmatpush3.bf16.msra.mxu0 %v640_v43  ;;  %v220_v50 = vadd.f32 %v579_v49, %v212_v45  ;;  %v196_v51 = vpop.f32.mrb[7].mxu0 }
 0x12a   :  { %v644_v52 = vpack.c.bf16 %v233_v46, %v232_v48  ;;  %657 = vmatpush3.bf16.msra.mxu1 %v640_v43  ;;  %v219_v53 = vadd.f32 %v211_v47, %v196_v51 }
 0x12b   :  { %v235_v54 = vmul.f32 %v495_v23, %v220_v50 }
 0x12c   :  { %239 = vxpose.xlu0.b32.cont [4/8] (short) %v216_v32, 128  ;;  %645 = vmatprep.subr.bf16.mxu0 %v644_v52  ;;  %v234_v55 = vmul.f32 %v495_v23, %v219_v53 }
 0x12d   :  { %654 = vmatprep.subr.bf16.mxu1 %v644_v52  ;;  %647 = vmatpush3.bf16.msra.mxu0 %v644_v52 }
 0x12e   :  { %v648_v56 = vpack.c.bf16 %v235_v54, %v234_v55  ;;  %658 = vmatpush3.bf16.msra.mxu1 %v644_v52 }
 0x130   :  { %240 = vxpose.xlu0.b32.cont [5/8] (short) %v217_v44, 128  ;;  %649 = vmatprep.subr.bf16.mxu0 %v648_v56 }
 0x131   :  { %655 = vmatprep.subr.bf16.mxu1 %v648_v56  ;;  %651 = vmatpush3.bf16.msra.mxu0 %v648_v56 }
 0x132   :  { %659 = vmatpush3.bf16.msra.mxu1 %v648_v56 }
 0x134   :  { %241 = vxpose.xlu0.b32.cont [6/8] (short) %v218_v41, 128 }
 0x138   :  { %242 = vxpose.xlu0.b32.cont [7/8] (short) %v219_v53, 128 }
 0x13c   :  { %243 = vxpose.xlu0.b32.end [8/8] (short) %v220_v50, 128 }
 0x1a0   :  { %v252_v57 = vpop.trf.xlu0 }
 0x1a1   :  { %596 = vmatprep.mubr.msk.f32.mxu0 %vm75_vm0, %v252_v57 }
 0x1a4   :  { %v253_v58 = vpop.trf.xlu0 }
 0x1a5   :  { %597 = vmatmul.mubr.msk.f32.vlgmr.msra.gmra.mrb[8].mxu0 %vm75_vm0, %v253_v58 }
 0x1a8   :  { %v254_v59 = vpop.trf.xlu0 }
 0x1a9   :  { %599 = vmatprep.mubr.msk.f32.mxu0 %vm75_vm0, %v254_v59 }
 0x1ac   :  { %v255_v60 = vpop.trf.xlu0 }
 0x1ad   :  { %600 = vmatmul.mubr.msk.f32.gmra.mrb[10].mxu0 %vm75_vm0, %v255_v60 }
 0x1b0   :  { %v256_v61 = vpop.trf.xlu0 }
 0x1b1   :  { %602 = vmatprep.mubr.msk.f32.mxu1 %vm75_vm0, %v256_v61 }
 0x1b4   :  { %v257_v62 = vpop.trf.xlu0 }
 0x1b5   :  { %603 = vmatmul.mubr.msk.f32.vlgmr.msra.gmra.mrb[0].mxu1 %vm75_vm0, %v257_v62 }
 0x1b8   :  { %v258_v63 = vpop.trf.xlu0 }
 0x1b9   :  { %605 = vmatprep.mubr.msk.f32.mxu1 %vm75_vm0, %v258_v63 }
 0x1bc   :  { %v259_v0 = vpop.trf.xlu0 }
 0x1bd   :  { %606 = vmatmul.mubr.msk.f32.gmra.mrb[2].mxu1 %vm75_vm0, %v259_v0 }
 0x1c0   :  { %v260_v1 = vpop.trf.xlu0 }
 0x1c1   :  { %608 = vmatprep.mubr.msk.f32.mxu1 %vm75_vm0, %v260_v1 }
 0x1c4   :  { %v261_v2 = vpop.trf.xlu0 }
 0x1c5   :  { %609 = vmatmul.mubr.msk.f32.gmra.mrb[4].mxu1 %vm75_vm0, %v261_v2 }
 0x1c8   :  { %v262_v3 = vpop.trf.xlu0 }
 0x1c9   :  { %611 = vmatprep.mubr.msk.f32.mxu1 %vm75_vm0, %v262_v3 }
 0x1cc   :  { %v263_v4 = vpop.trf.xlu0 }
 0x1cd   :  { %612 = vmatmul.mubr.msk.f32.gmra.mrb[6].mxu1 %vm75_vm0, %v263_v4 }
 0x1d0   :  { %v264_v5 = vpop.trf.xlu0 }
 0x1d1   :  { %614 = vmatprep.mubr.msk.f32.mxu1 %vm75_vm0, %v264_v5 }
 0x1d4   :  { %v265_v6 = vpop.trf.xlu0 }
 0x1d5   :  { %615 = vmatmul.mubr.msk.f32.gmra.mrb[8].mxu1 %vm75_vm0, %v265_v6 }
 0x1d8   :  { %v266_v7 = vpop.trf.xlu0 }
 0x1d9   :  { %617 = vmatprep.mubr.msk.f32.mxu1 %vm75_vm0, %v266_v7 }
 0x1dc   :  { %v267_v8 = vpop.trf.xlu0 }
 0x1dd   :  { %618 = vmatmul.mubr.msk.f32.gmra.mrb[10].mxu1 %vm75_vm0, %v267_v8 }
 0x278   :  { %v598_v9 = vpop.f32.mrb[8].mxu0 }
 0x279   :  { %458 = vst [vmem:[#allocation8 + $0x8] sm:$0xff] %v598_v9  ;;  %v382_v10 = vpop.f32.mrb[9].mxu0 }
 0x27a   :  { %457 = vst [vmem:[#allocation8] sm:$0xff] %v382_v10 }
 0x280   :  { %v601_v11 = vpop.f32.mrb[10].mxu0 }
 0x281   :  { %460 = vst [vmem:[#allocation8 + $0x18] sm:$0xff] %v601_v11  ;;  %v392_v12 = vpop.f32.mrb[11].mxu0 }
 0x282   :  { %459 = vst [vmem:[#allocation8 + $0x10] sm:$0xff] %v392_v12 }
 0x288   :  { %v604_v13 = vpop.f32.mrb[0].mxu1 }
 0x289   :  { %462 = vst [vmem:[#allocation8 + $0x28] sm:$0xff] %v604_v13  ;;  %v402_v14 = vpop.f32.mrb[1].mxu1 }
 0x28a   :  { %461 = vst [vmem:[#allocation8 + $0x20] sm:$0xff] %v402_v14 }
 0x290   :  { %v607_v15 = vpop.f32.mrb[2].mxu1 }
 0x291   :  { %464 = vst [vmem:[#allocation8 + $0x38] sm:$0xff] %v607_v15  ;;  %v412_v16 = vpop.f32.mrb[3].mxu1 }
 0x292   :  { %463 = vst [vmem:[#allocation8 + $0x30] sm:$0xff] %v412_v16 }
 0x298   :  { %v610_v17 = vpop.f32.mrb[4].mxu1 }
 0x299   :  { %466 = vst [vmem:[#allocation8 + $0x48] sm:$0xff] %v610_v17  ;;  %v422_v18 = vpop.f32.mrb[5].mxu1 }
 0x29a   :  { %465 = vst [vmem:[#allocation8 + $0x40] sm:$0xff] %v422_v18 }
 0x2a0   :  { %v613_v19 = vpop.f32.mrb[6].mxu1 }
 0x2a1   :  { %468 = vst [vmem:[#allocation8 + $0x58] sm:$0xff] %v613_v19  ;;  %v432_v20 = vpop.f32.mrb[7].mxu1 }
 0x2a2   :  { %467 = vst [vmem:[#allocation8 + $0x50] sm:$0xff] %v432_v20 }
 0x2a3   :  { %744 = shalt.err (!%p741_p0)
}
 0x2a4   :  { %s745_s6 = scalar_lea.hbm %s890_s4, 1536 }
 0x2a5   :  { %p746_p1 = scmp.ne.s32.totalorder %s890_s4, %s745_s6  ;;  %p749_p2 = scmp.lt.u32.totalorder %s745_s6, %s890_s4 }
 0x2a7   :  { %p751_p3 = pnand %p749_p2, %p746_p1 }
 0x2a9   :  { %754 = shalt.err (!%p751_p3)
}
 0x2aa   :  { %480 = dma.vmem_to_hbm [thread:$0]  %s475_s26, 1536, %s890_s4, [#allocation4], %s763_s27, %s763_s27, %s764_s28   ;;  %v616_v21 = vpop.f32.mrb[8].mxu1 }
 0x2ab   :  { %v442_v22 = vpop.f32.mrb[9].mxu1 }
 0x2b0   :  { %v619_v23 = vpop.f32.mrb[10].mxu1 }
 0x2b1   :  { %v450_v24 = vpop.f32.mrb[11].mxu1 }
 0x2b2   :  { %759 = dma.done.wait [#allocation4], 1536  }
 0x2b3   :  { %760 = vsyncadd [#allocation4], 4294965760 }
 0x2b4   :  { %484 = vsyncpa [#allocation3], 1 }
 0x2b5   :  { %485 = vsyncpa [#allocation6], 1 }
 0x2b6   :  { %486 = vsyncpa [#allocation4], 1 }

</bundles_post_ra>
